<compile_context>
chip_gen: v6e
topology: v6e:2x2x1
jax: 0.10.0
libtpu: 0.0.40
codegen_flags: <defaults>
</compile_context>

<pallas_src>
import jax
import jax.numpy as jnp
from jax.experimental import pallas as pl
from jax.experimental.pallas import tpu as pltpu

# Constants from AEPostProcessing.__init__ (channel_wise_normalisation=True)
_SCALE_DENOM = jnp.array(
    [2.01, 1.99, 1.88, 1.89, 2.01, 2.02, 2.61, 2.65, 1.89, 2.32, 2.05, 1.94,
     2.07, 1.85, 2.21, 2.06, 2.13, 2.10, 2.02, 1.93, 2.29, 2.04, 2.02, 2.07,
     4.66, 2.34, 2.18, 1.95, 1.98, 1.84, 2.01, 1.87], dtype=jnp.float32)
_BIAS_RAW = jnp.array(
    [-0.12, 0.05, 0.14, 0.07, -0.15, 0.62, 0.37, 1.67, 0.11, -0.85, 0.53,
     -0.04, -0.32, 0.18, -0.14, 0.14, 0.15, 0.32, 0.47, -0.01, -0.15, 0.17,
     -0.39, -0.05, -0.29, 0.30, 0.64, 0.01, 0.15, -0.26, 0.53, 0.11],
    dtype=jnp.float32)

_NUM_LATENT_CHANNELS = 32


def _postproc_kernel(x_ref, a_ref, b_ref, o_ref):
    """Fused de-norm + remap-to-uint8 tile kernel.

    x_ref: (br, bhw) f32   a_ref/b_ref: (br, 1) f32 per-row affine   o_ref: (br, bhw) u8
    Computes img = x * a + b  (==  ((x - bias)/scale + 1) * 127.5), clips to [0, 255],
    and truncate-casts to uint8 (matches PyTorch .to(uint8) after clamp).
    """
    img = x_ref[...] * a_ref[...] + b_ref[...]
    img = jnp.clip(img, 0.0, 255.0)
    o_ref[...] = img.astype(jnp.uint8)


def _pick_block(total, align, max_block):
    """Largest multiple of `align` (<= max_block) that evenly divides `total`;
    falls back to the full extent (always legal for a BlockSpec)."""
    b = (max_block // align) * align
    while b >= align:
        if total % b == 0 and b <= total:
            return b
        b -= align
    return total


def ae_decoder_post_processing(x, *, max_block_rows=256, max_block_hw=2048):
    """x: (N, C=32, H, W) float32 NCHW latent.  Returns (N, C, H, W) uint8."""
    n, c, h, w = x.shape
    assert c == _NUM_LATENT_CHANNELS, "AEPostProcessing buffers are defined for 32 channels"

    scale = 0.5 / _SCALE_DENOM            # (32,)  == module's `scale`
    bias = -_BIAS_RAW * scale             # (32,)  == module's `bias`
    inv_scale = 1.0 / scale

    # TODO(synk): self.ae.decode(y).sample is an externally-injected pretrained VAE decoder
    # (no architecture defined in this module); it is treated as identity here, so the
    # remap-to-uint8 is fused directly onto the de-normalised latent.
    # Fold (x - bias) * inv_scale -> (y + 1) * 127.5 into a single per-row mul-add.
    a = inv_scale * 127.5                                  # (32,)
    b = 127.5 - bias * inv_scale * 127.5                   # (32,)

    nc = n * c
    hw = h * w
    x2 = x.reshape(nc, hw)
    # Per-row (= per-channel) affine columns; tiny (nc, 1) arrays built in plain JAX.
    a2 = jnp.tile(a, (n,)).reshape(nc, 1).astype(jnp.float32)
    b2 = jnp.tile(b, (n,)).reshape(nc, 1).astype(jnp.float32)

    # Tile sizes: 32-row multiples (uint8 packs 4 rows/sublane) and lane-dense 128-multiples.
    # Kept small enough (<= 256 x 2048 f32 ~= 2 MiB per input buffer, double-buffered) to fit
    # the scoped-VMEM limits on every generation (16 MiB v5e / 32 MiB v6e / 32-of-64 MiB v7x).
    block_rows = _pick_block(nc, 32, max_block_rows)
    block_hw = _pick_block(hw, 128, max_block_hw)
    grid = (pl.cdiv(nc, block_rows), pl.cdiv(hw, block_hw))

    out = pl.pallas_call(
        _postproc_kernel,
        out_shape=jax.ShapeDtypeStruct((nc, hw), jnp.uint8),
        grid=grid,
        in_specs=[
            pl.BlockSpec((block_rows, block_hw), lambda i, j: (i, j)),
            pl.BlockSpec((block_rows, 1), lambda i, j: (i, 0)),
            pl.BlockSpec((block_rows, 1), lambda i, j: (i, 0)),
        ],
        out_specs=pl.BlockSpec((block_rows, block_hw), lambda i, j: (i, j)),
        compiler_params=pltpu.CompilerParams(
            dimension_semantics=("parallel", "parallel"),
            vmem_limit_bytes=32 * 1024 * 1024,
        ),
    )(x2, a2, b2)

    return out.reshape(n, c, h, w)


if __name__ == "__main__":
    key = jax.random.PRNGKey(0)
    # N=2, C=32 (fixed by the module's buffers), H=W=16 latent spatial size.
    x = jax.random.normal(key, (2, _NUM_LATENT_CHANNELS, 16, 16), dtype=jnp.float32)

    out = ae_decoder_post_processing(x)
    out = jax.block_until_ready(out)

    # Pure-JAX reference with the ORIGINAL op ordering of the module:
    #   y = (x - bias) / scale ; img = clamp((y + 1) * 127.5, 0, 255).to(uint8)
    scale_r = (0.5 / _SCALE_DENOM).reshape(1, -1, 1, 1)
    bias_r = (-_BIAS_RAW * (0.5 / _SCALE_DENOM)).reshape(1, -1, 1, 1)
    y_ref = (x - bias_r) / scale_r
    ref = jnp.clip((y_ref + 1.0) * 0.5 * 255.0, 0.0, 255.0).astype(jnp.uint8)

    assert out.shape == (2, _NUM_LATENT_CHANNELS, 16, 16)
    assert out.dtype == jnp.uint8
    # The kernel uses the mathematically-equivalent fused form x*a + b; allow a 1-LSB
    # tolerance for float rounding near integer truncation boundaries.
    max_diff = int(jnp.max(jnp.abs(out.astype(jnp.int32) - ref.astype(jnp.int32))))
    assert max_diff <= 1, f"max uint8 difference vs reference = {max_diff}"
    print("KERNEL_OK")
</pallas_src>

<mosaic_0001>
module attributes {stable_mosaic.version = 11 : i64} {
  func.func @_postproc_kernel(%arg0: i32, %arg1: i32, %arg2: memref<64x256xf32, #tpu.memory_space<vmem>>, %arg3: memref<64x1xf32, #tpu.memory_space<vmem>>, %arg4: memref<64x1xf32, #tpu.memory_space<vmem>>, %arg5: memref<64x256xi8, #tpu.memory_space<vmem>>) attributes {dimension_semantics = [#tpu.dimension_semantics<parallel>, #tpu.dimension_semantics<parallel>], iteration_bounds = array<i64: 1, 1>, scalar_prefetch = 0 : i64, scratch_operands = 0 : i64, tpu.core_type = #tpu.core_type<tc>, window_params = [{transform_indices = @transform_0, window_bounds = array<i64: 64, 256>}, {transform_indices = @transform_1, window_bounds = array<i64: 64, 1>}, {transform_indices = @transform_2, window_bounds = array<i64: 64, 1>}, {transform_indices = @transform_3, window_bounds = array<i64: 64, 256>}]} {
    %c0 = arith.constant 0 : index
    %c0_0 = arith.constant 0 : index
    %0 = vector.load %arg2[%c0, %c0_0] : memref<64x256xf32, #tpu.memory_space<vmem>>, vector<64x256xf32>
    %c0_1 = arith.constant 0 : index
    %c0_2 = arith.constant 0 : index
    %1 = vector.load %arg3[%c0_1, %c0_2] : memref<64x1xf32, #tpu.memory_space<vmem>>, vector<64x1xf32>
    %2 = vector.broadcast %1 : vector<64x1xf32> to vector<64x256xf32>
    %3 = arith.mulf %0, %2 : vector<64x256xf32>
    %c0_3 = arith.constant 0 : index
    %c0_4 = arith.constant 0 : index
    %4 = vector.load %arg4[%c0_3, %c0_4] : memref<64x1xf32, #tpu.memory_space<vmem>>, vector<64x1xf32>
    %5 = vector.broadcast %4 : vector<64x1xf32> to vector<64x256xf32>
    %6 = arith.addf %3, %5 : vector<64x256xf32>
    %cst = arith.constant 0.000000e+00 : f32
    %cst_5 = arith.constant 2.550000e+02 : f32
    %7 = vector.broadcast %cst : f32 to vector<64x256xf32>
    %8 = arith.maximumf %7, %6 : vector<64x256xf32>
    %9 = vector.broadcast %cst_5 : f32 to vector<64x256xf32>
    %10 = arith.minimumf %9, %8 : vector<64x256xf32>
    %11 = arith.fptoui %10 : vector<64x256xf32> to vector<64x256xi8>
    %c0_6 = arith.constant 0 : index
    %c0_7 = arith.constant 0 : index
    %12 = vector.load %arg5[%c0_6, %c0_7] : memref<64x256xi8, #tpu.memory_space<vmem>>, vector<64x256xi8>
    tpu.vector_store %arg5[%c0_6, %c0_7], %11 {strides = array<i32>} : memref<64x256xi8, #tpu.memory_space<vmem>>, vector<64x256xi8>,
    return
  }
  func.func @transform_0(%arg0: i32, %arg1: i32) -> (i32, i32) {
    %c0_i32 = arith.constant 0 : i32
    return %arg0, %arg1 : i32, i32
  }
  func.func @transform_1(%arg0: i32, %arg1: i32) -> (i32, i32) {
    %c0_i32 = arith.constant 0 : i32
    %c0_i32_0 = arith.constant 0 : i32
    return %arg0, %c0_i32 : i32, i32
  }
  func.func @transform_2(%arg0: i32, %arg1: i32) -> (i32, i32) {
    %c0_i32 = arith.constant 0 : i32
    %c0_i32_0 = arith.constant 0 : i32
    return %arg0, %c0_i32 : i32, i32
  }
  func.func @transform_3(%arg0: i32, %arg1: i32) -> (i32, i32) {
    %c0_i32 = arith.constant 0 : i32
    return %arg0, %arg1 : i32, i32
  }
}

</mosaic_0001>

<bundles_post_ra>
// kernel: tpu_custom_call.1
= control target key start
LH: loop header
LB: loop body
LE: loop exit
PB: predicated region body
PF: predicated region fallthrough
CT: control target
= control target key end

     0   :  { %v347_v2 = vmov 0   ;;  %s470_s0 = inlined_call_operand.vmem [shape: f32[64,256], index: 0, kind: input, shape index: {}]   ;;  %s471_s1 = inlined_call_operand.vmem [shape: f32[64,1], index: 1, kind: input, shape index: {}]   ;;  %s472_s2 = inlined_call_operand.vmem [shape: f32[64,1], index: 2, kind: input, shape index: {}]   ;;  %s473_s3 = inlined_call_operand.hbm [shape: u8[64,256], index: 3, kind: output, shape index: {}]  }
   0x1   :  { %v33_v0 = vld [vmem:[%s471_s1 + $0x10] sm:$0xff]  ;;  %v31_v1 = vld [vmem:[%s471_s1] sm:$0xff]  ;;  %324 = vset.pattern.permute.xlu1 %v347_v2  ;;  %323 = vset.pattern.permute.xlu0 %v347_v2  ;;  %v34_v3 = vld [vmem:[%s471_s1 + $0x18] sm:$0xff] }
   0x2   :  { %51 = vperm.xlu1 %324, %v33_v0   ;;  %41 = vperm.xlu0 %323, %v31_v1   ;;  %v32_v4 = vld [vmem:[%s471_s1 + $0x8] sm:$0xff]  ;;  %v35_v6 = vld [vmem:[%s471_s1 + $0x20] sm:$0xff] }
   0x3   :  { %v36_v5 = vld [vmem:[%s471_s1 + $0x28] sm:$0xff] }
   0x6   :  { %56 = vperm.xlu1 %324, %v34_v3   ;;  %46 = vperm.xlu0 %323, %v32_v4  }
   0xa   :  { %66 = vperm.xlu1 %324, %v36_v5   ;;  %61 = vperm.xlu0 %323, %v35_v6  }
   0xb   :  { %8 = vsyncpa [#allocation3], 0  ;;  %v38_v7 = vld [vmem:[%s471_s1 + $0x38] sm:$0xff]  ;;  %v37_v8 = vld [vmem:[%s471_s1 + $0x30] sm:$0xff] }
   0xc   :  { %v96_v9 = vld [vmem:[%s472_s2 + $0x8] sm:$0xff]  ;;  %v95_v10 = vld [vmem:[%s472_s2] sm:$0xff]  ;;  %v98_v11 = vld [vmem:[%s472_s2 + $0x18] sm:$0xff] }
   0xd   :  { %v97_v12 = vld [vmem:[%s472_s2 + $0x10] sm:$0xff]  ;;  %v100_v13 = vld [vmem:[%s472_s2 + $0x28] sm:$0xff]  ;;  %v99_v14 = vld [vmem:[%s472_s2 + $0x20] sm:$0xff] }
   0xe   :  { %76 = vperm.xlu1 %324, %v38_v7   ;;  %71 = vperm.xlu0 %323, %v37_v8   ;;  %v102_v15 = vld [vmem:[%s472_s2 + $0x38] sm:$0xff]  ;;  %v101_v16 = vld [vmem:[%s472_s2 + $0x30] sm:$0xff]  ;;  %v15_v23 = vld [vmem:[%s470_s0] sm:$0xff] }
   0xf   :  { %v16_v24 = vld [vmem:[%s470_s0 + $0x8] sm:$0xff]  ;;  %v17_v25 = vld [vmem:[%s470_s0 + $0x10] sm:$0xff]  ;;  %v18_v26 = vld [vmem:[%s470_s0 + $0x18] sm:$0xff] }
  0x10   :  { %v19_v29 = vld [vmem:[%s470_s0 + $0x20] sm:$0xff]  ;;  %v20_v30 = vld [vmem:[%s470_s0 + $0x28] sm:$0xff]  ;;  %v21_v31 = vld [vmem:[%s470_s0 + $0x30] sm:$0xff] }
  0x11   :  { %v22_v34 = vld [vmem:[%s470_s0 + $0x38] sm:$0xff]  ;;  %v25_v37 = vld [vmem:[%s470_s0 + $0x50] sm:$0xff]  ;;  %v23_v41 = vld [vmem:[%s470_s0 + $0x40] sm:$0xff] }
  0x12   :  { %110 = vperm.xlu1 %324, %v96_v9   ;;  %105 = vperm.xlu0 %323, %v95_v10   ;;  %v26_v38 = vld [vmem:[%s470_s0 + $0x58] sm:$0xff]  ;;  %v24_v44 = vld [vmem:[%s470_s0 + $0x48] sm:$0xff]  ;;  %v29_v45 = vld [vmem:[%s470_s0 + $0x70] sm:$0xff] }
  0x13   :  { %v30_v46 = vld [vmem:[%s470_s0 + $0x78] sm:$0xff]  ;;  %v27_v63 = vld [vmem:[%s470_s0 + $0x60] sm:$0xff]  ;;  %v28_v0 = vld [vmem:[%s470_s0 + $0x68] sm:$0xff]  ;;  %s348_s0 = smov [#allocation2]  }
  0x14   :  { %s260_s19 = sshll.u32 %s348_s0, 4  ;;  %s261_s19 = int_to_ptr.vmem [resolvable:$true] %s260_s19 }
  0x15   :  { %s325_s20 = scalar_lea.vmem %s261_s19, 512  ;;  %p330_p1 = scmp.lt.s32.totalorder %s261_s19, %s261_s19 }
  0x16   :  { %120 = vperm.xlu1 %324, %v98_v11   ;;  %115 = vperm.xlu0 %323, %v97_v12   ;;  %p326_p0 = scmp.ne.s32.totalorder %s261_s19, %s325_s20  ;;  %p331_p2 = scmp.lt.s32.totalorder %s325_s20, %s325_s20 }
  0x18   :  { %p332_p3 = por %p331_p2, %p330_p1 }
  0x1a   :  { %130 = vperm.xlu1 %324, %v100_v13   ;;  %125 = vperm.xlu0 %323, %v99_v14   ;;  %p333_p4 = pnand %p332_p3, %p326_p0 }
  0x1e   :  { %140 = vperm.xlu1 %324, %v102_v15   ;;  %135 = vperm.xlu0 %323, %v101_v16  }
  0x7d   :  { %v52_v17 = vpop.permute.xlu1 %51  ;;  %v42_v18 = vpop.permute.xlu0 %41 }
  0x7e   :  { %v79_v32 = vmul.f32 %v42_v18, %v15_v23  ;;  %v80_v33 = vmul.f32 %v42_v18, %v16_v24  ;;  %v83_v39 = vmul.f32 %v52_v17, %v19_v29  ;;  %v84_v40 = vmul.f32 %v52_v17, %v20_v30 }
  0x81   :  { %v57_v19 = vpop.permute.xlu1 %56  ;;  %v47_v20 = vpop.permute.xlu0 %46 }
  0x82   :  { %v81_v35 = vmul.f32 %v47_v20, %v17_v25  ;;  %v82_v36 = vmul.f32 %v47_v20, %v18_v26  ;;  %v85_v51 = vmul.f32 %v57_v19, %v21_v31  ;;  %v86_v52 = vmul.f32 %v57_v19, %v22_v34 }
  0x85   :  { %v67_v21 = vpop.permute.xlu1 %66  ;;  %v62_v22 = vpop.permute.xlu0 %61 }
  0x86   :  { %v89_v53 = vmul.f32 %v67_v21, %v25_v37  ;;  %v90_v54 = vmul.f32 %v67_v21, %v26_v38  ;;  %v87_v59 = vmul.f32 %v62_v22, %v23_v41  ;;  %v88_v60 = vmul.f32 %v62_v22, %v24_v44 }
  0x89   :  { %v77_v27 = vpop.permute.xlu1 %76  ;;  %v72_v28 = vpop.permute.xlu0 %71 }
  0x8a   :  { %v93_v61 = vmul.f32 %v77_v27, %v29_v45  ;;  %v94_v62 = vmul.f32 %v77_v27, %v30_v46  ;;  %v91_v11 = vmul.f32 %v72_v28, %v27_v63  ;;  %v92_v12 = vmul.f32 %v72_v28, %v28_v0 }
  0x8d   :  { %v111_v42 = vpop.permute.xlu1 %110  ;;  %v106_v43 = vpop.permute.xlu0 %105 }
  0x8e   :  { %v145_v47 = vadd.f32 %v111_v42, %v81_v35  ;;  %v146_v48 = vadd.f32 %v111_v42, %v82_v36  ;;  %v143_v49 = vadd.f32 %v106_v43, %v79_v32  ;;  %v144_v50 = vadd.f32 %v106_v43, %v80_v33 }
  0x90   :  { %v273_v55 = vclamp-gez-f32 %v145_v47, 255.0  ;;  %v274_v56 = vclamp-gez-f32 %v146_v48, 255.0  ;;  %v271_v57 = vclamp-gez-f32 %v143_v49, 255.0  ;;  %v272_v58 = vclamp-gez-f32 %v144_v50, 255.0 }
  0x91   :  { %v121_v1 = vpop.permute.xlu1 %120  ;;  %v116_v2 = vpop.permute.xlu0 %115 }
  0x92   :  { %v291_v3 = vtrunc.f32 %v273_v55  ;;  %v293_v4 = vtrunc.f32 %v274_v56  ;;  %v287_v5 = vtrunc.f32 %v271_v57  ;;  %v289_v6 = vtrunc.f32 %v272_v58 }
  0x93   :  { %v149_v7 = vadd.f32 %v121_v1, %v85_v51  ;;  %v150_v8 = vadd.f32 %v121_v1, %v86_v52  ;;  %v147_v9 = vadd.f32 %v116_v2, %v83_v39  ;;  %v148_v10 = vadd.f32 %v116_v2, %v84_v40 }
  0x94   :  { %v292_v13 = vcvt.f32.s32 %v291_v3  ;;  %v294_v14 = vcvt.f32.s32 %v293_v4  ;;  %v288_v21 = vcvt.f32.s32 %v287_v5  ;;  %v290_v22 = vcvt.f32.s32 %v289_v6 }
  0x95   :  { %v277_v15 = vclamp-gez-f32 %v149_v7, 255.0  ;;  %v278_v16 = vclamp-gez-f32 %v150_v8, 255.0  ;;  %v275_v17 = vclamp-gez-f32 %v147_v9, 255.0  ;;  %v276_v18 = vclamp-gez-f32 %v148_v10, 255.0  ;;  %v131_v19 = vpop.permute.xlu1 %130  ;;  %v126_v20 = vpop.permute.xlu0 %125 }
  0x96   :  { %v153_v23 = vadd.f32 %v131_v19, %v89_v53  ;;  %v154_v24 = vadd.f32 %v131_v19, %v90_v54  ;;  %v151_v32 = vadd.f32 %v126_v20, %v87_v59  ;;  %v152_v28 = vadd.f32 %v126_v20, %v88_v60 }
  0x97   :  { %v299_v25 = vtrunc.f32 %v277_v15  ;;  %v301_v26 = vtrunc.f32 %v278_v16  ;;  %v295_v27 = vtrunc.f32 %v275_v17  ;;  %v297_v29 = vtrunc.f32 %v276_v18 }
  0x98   :  { %v281_v30 = vclamp-gez-f32 %v153_v23, 255.0  ;;  %v282_v31 = vclamp-gez-f32 %v154_v24, 255.0  ;;  %v239_v38 = vpack.c.b16 %v292_v13, %v288_v21  ;;  %v242_v39 = vpack.c.b16 %v294_v14, %v290_v22 }
  0x99   :  { %v300_v33 = vcvt.f32.s32 %v299_v25  ;;  %v302_v34 = vcvt.f32.s32 %v301_v26  ;;  %v296_v35 = vcvt.f32.s32 %v295_v27  ;;  %v298_v36 = vcvt.f32.s32 %v297_v29  ;;  %v141_v37 = vpop.permute.xlu1 %140  ;;  %v136_v46 = vpop.permute.xlu0 %135 }
  0x9a   :  { %v279_v40 = vclamp-gez-f32 %v151_v32, 255.0  ;;  %v280_v41 = vclamp-gez-f32 %v152_v28, 255.0  ;;  %v157_v44 = vadd.f32 %v141_v37, %v93_v61  ;;  %v158_v45 = vadd.f32 %v141_v37, %v94_v62 }
  0x9b   :  { %v240_v42 = vpack.c.b16 %v300_v33, %v296_v35  ;;  %v243_v43 = vpack.c.b16 %v302_v34, %v298_v36  ;;  %v307_v47 = vtrunc.f32 %v281_v30  ;;  %v309_v48 = vtrunc.f32 %v282_v31 }
  0x9c   :  { %v303_v49 = vtrunc.f32 %v279_v40  ;;  %v305_v50 = vtrunc.f32 %v280_v41  ;;  %v285_v53 = vclamp-gez-f32 %v157_v44, 255.0  ;;  %v286_v54 = vclamp-gez-f32 %v158_v45, 255.0 }
  0x9d   :  { %v241_v51 = vpack.c.b8 %v240_v42, %v239_v38  ;;  %v244_v52 = vpack.c.b8 %v243_v43, %v242_v39  ;;  %v155_v55 = vadd.f32 %v136_v46, %v91_v11  ;;  %v156_v56 = vadd.f32 %v136_v46, %v92_v12 }
  0x9e   :  { %v315_v57 = vtrunc.f32 %v285_v53  ;;  %v317_v58 = vtrunc.f32 %v286_v54  ;;  %v308_v63 = vcvt.f32.s32 %v307_v47  ;;  %v310_v61 = vcvt.f32.s32 %v309_v48 }
  0x9f   :  { %251 = vst [vmem:[#allocation2] sm:$0xff] %v241_v51  ;;  %252 = vst [vmem:[#allocation2 + $0x8] sm:$0xff] %v244_v52  ;;  %v283_v59 = vclamp-gez-f32 %v155_v55, 255.0  ;;  %v284_v60 = vclamp-gez-f32 %v156_v56, 255.0  ;;  %v304_v62 = vcvt.f32.s32 %v303_v49  ;;  %v306_v0 = vcvt.f32.s32 %v305_v50 }
  0xa0   :  { %v316_v1 = vcvt.f32.s32 %v315_v57  ;;  %v318_v2 = vcvt.f32.s32 %v317_v58 }
  0xa1   :  { %v311_v3 = vtrunc.f32 %v283_v59  ;;  %v313_v4 = vtrunc.f32 %v284_v60  ;;  %v245_v7 = vpack.c.b16 %v308_v63, %v304_v62  ;;  %v248_v8 = vpack.c.b16 %v310_v61, %v306_v0 }
  0xa3   :  { %v312_v5 = vcvt.f32.s32 %v311_v3  ;;  %v314_v6 = vcvt.f32.s32 %v313_v4 }
  0xa5   :  { %v246_v9 = vpack.c.b16 %v316_v1, %v312_v5  ;;  %v249_v10 = vpack.c.b16 %v318_v2, %v314_v6 }
  0xa7   :  { %v247_v11 = vpack.c.b8 %v246_v9, %v245_v7  ;;  %v250_v12 = vpack.c.b8 %v249_v10, %v248_v8 }
  0xa9   :  { %253 = vst [vmem:[#allocation2 + $0x10] sm:$0xff] %v247_v11  ;;  %254 = vst [vmem:[#allocation2 + $0x18] sm:$0xff] %v250_v12 }
  0xaa   :  { %336 = shalt.err (!%p333_p4)
}
  0xab   :  { %s349_s21 = smov 256   ;;  %s350_s2 = smov 16  }
  0xac   :  { %266 = dma.vmem_to_hbm [thread:$0]  %s261_s19, 512, %s473_s3, [#allocation3], %s349_s21, %s349_s21, %s350_s2  }
  0xad   :  { %345 = dma.done.wait [#allocation3], 512  }
  0xae   :  { %346 = vsyncadd [#allocation3], 4294966784 }
  0xaf   :  { %270 = vsyncpa [#allocation3], 1 }

</bundles_post_ra>
